<compile_context>
chip_gen: v7x
topology: tpu7x:2x2x1
jax: 0.10.0
libtpu: 0.0.40
codegen_flags: <defaults>
</compile_context>

<pallas_src>
import functools

import jax
import jax.numpy as jnp
from jax.experimental import pallas as pl
from jax.experimental.pallas import tpu as pltpu


def _round_up(x: int, m: int) -> int:
    return ((x + m - 1) // m) * m


def _decoder_kernel(b_ref, u_ref, vt_ref, scale_ref, bias_ref, logits_ref):
    # b_ref:     (tm, 1)       int32  batch index per row
    # u_ref:     (tm, K)       f32    data-embedding rows
    # vt_ref:    (K, tn)       f32    feature embedding, pre-transposed
    # scale_ref: (nb_pad, tn)  f32    softplus(scale_lin)
    # bias_ref:  (nb_pad, tn)  f32    bias
    # logits_ref:(tm, tn)      f32
    tm = u_ref.shape[0]
    nb_pad = scale_ref.shape[0]

    # In-kernel batch gather: one-hot built on the VPU, selection done as two
    # tiny MXU matmuls (n_batches is small; MXU slack is free here).
    bvals = b_ref[...]                                              # (tm, 1)
    iota = jax.lax.broadcasted_iota(jnp.int32, (tm, nb_pad), 1)     # (tm, nb_pad)
    onehot = (bvals == iota).astype(jnp.float32)                    # (tm, nb_pad)

    dn = (((1,), (0,)), ((), ()))
    scale_rows = jax.lax.dot_general(
        onehot, scale_ref[...], dn,
        precision=jax.lax.Precision.HIGHEST,
        preferred_element_type=jnp.float32,
    )                                                               # (tm, tn)
    bias_rows = jax.lax.dot_general(
        onehot, bias_ref[...], dn,
        precision=jax.lax.Precision.HIGHEST,
        preferred_element_type=jnp.float32,
    )                                                               # (tm, tn)

    # Canonical (tm, K) @ (K, tn): no transpose / relayout of the v tile.
    rec = jax.lax.dot_general(
        u_ref[...], vt_ref[...], dn,
        precision=jax.lax.Precision.HIGHEST,
        preferred_element_type=jnp.float32,
    )                                                               # (tm, tn)

    logits_ref[...] = scale_rows * rec + bias_rows


@functools.partial(jax.jit, static_argnames=("tm", "tn"))
def ber_data_decoder(u, v, b, l, scale_lin, bias, *, tm=512, tn=2048):
    """Pallas implementation of BerDataDecoder.forward.

    u: (N, K) float32   data embedding
    v: (F, K) float32   feature embedding
    b: (N,)   int       batch index per row
    l: (N,)   float32   library size (unused, kept for signature parity)
    scale_lin, bias: (n_batches, F) float32 parameters
    Returns logits, shape (N, F) float32 (Bernoulli(logits=logits)).
    """
    del l  # unused by the Bernoulli decoder, same as the PyTorch module
    N, K = u.shape
    F_, _ = v.shape
    nb = scale_lin.shape[0]

    # Hoist softplus to the tiny (n_batches, F) parameter.
    scale_sp = jax.nn.softplus(scale_lin.astype(jnp.float32))       # (nb, F)
    bias_f = bias.astype(jnp.float32)

    # Tiny sublane pad along the batch axis only (at most 7 extra rows of F).
    nb_pad = _round_up(nb, 8)
    if nb_pad != nb:
        scale_sp = jnp.pad(scale_sp, ((0, nb_pad - nb), (0, 0)))
        bias_f = jnp.pad(bias_f, ((0, nb_pad - nb), (0, 0)))

    # Pre-transpose v once: (K, F) gives contiguous, lane-dense feature tiles.
    u_f = u.astype(jnp.float32)
    v_t = jnp.transpose(v.astype(jnp.float32))                      # (K, F)
    b_col = b.astype(jnp.int32).reshape(N, 1)

    # Clamp tiles for small problems; keep (8, 128) alignment of the block.
    tm = min(tm, _round_up(N, 8))
    tn = min(tn, _round_up(F_, 128))

    # Degenerate sub-tile case only: pad so no block dim exceeds the array dim.
    # For any realistically sized input this is a no-op (no pad, no slice).
    row_pad = tm - N if tm > N else 0
    col_pad = tn - F_ if tn > F_ else 0
    if row_pad:
        u_f = jnp.pad(u_f, ((0, row_pad), (0, 0)))
        b_col = jnp.pad(b_col, ((0, row_pad), (0, 0)))
    if col_pad:
        v_t = jnp.pad(v_t, ((0, 0), (0, col_pad)))
        scale_sp = jnp.pad(scale_sp, ((0, 0), (0, col_pad)))
        bias_f = jnp.pad(bias_f, ((0, 0), (0, col_pad)))
    N_out, F_out = N + row_pad, F_ + col_pad

    # Feature tiles outermost, row tiles innermost: v / scale / bias blocks are
    # only re-DMA'd when the feature tile changes.  Ragged boundary blocks are
    # masked by Pallas (no full-array pad, no output slice).
    grid = (pl.cdiv(F_out, tn), pl.cdiv(N_out, tm))

    logits = pl.pallas_call(
        _decoder_kernel,
        out_shape=jax.ShapeDtypeStruct((N_out, F_out), jnp.float32),
        grid_spec=pltpu.PrefetchScalarGridSpec(
            num_scalar_prefetch=0,
            grid=grid,
            in_specs=[
                pl.BlockSpec((tm, 1), lambda j, i: (i, 0)),         # b (int32)
                pl.BlockSpec((tm, K), lambda j, i: (i, 0)),         # u rows
                pl.BlockSpec((K, tn), lambda j, i: (0, j)),         # v.T cols
                pl.BlockSpec((nb_pad, tn), lambda j, i: (0, j)),    # softplus(scale)
                pl.BlockSpec((nb_pad, tn), lambda j, i: (0, j)),    # bias
            ],
            out_specs=pl.BlockSpec((tm, tn), lambda j, i: (i, j)),
        ),
        compiler_params=pltpu.CompilerParams(
            dimension_semantics=("parallel", "parallel"),
            vmem_limit_bytes=48 * 1024 * 1024,
        ),
    )(b_col, u_f, v_t, scale_sp, bias_f)

    if row_pad or col_pad:
        logits = logits[:N, :F_]
    return logits


def _xavier_uniform(key, shape):
    # PyTorch xavier_uniform_ on a (n_batches, n_features) 2-D tensor:
    # fan_out = shape[0], fan_in = shape[1]
    fan_out, fan_in = shape
    bound = (6.0 / (fan_in + fan_out)) ** 0.5
    return jax.random.uniform(key, shape, jnp.float32, -bound, bound)


if __name__ == "__main__":
    # Small shapes consistent with the module: N cells, K latent dims,
    # F features, n_batches experimental batches.  N and F are deliberately
    # NOT tile multiples to exercise the ragged (masked) boundary blocks.
    N, K, F_, n_batches = 50, 32, 300, 3

    key = jax.random.PRNGKey(0)
    k_u, k_v, k_b, k_l, k_s, k_bias = jax.random.split(key, 6)

    u = jax.random.normal(k_u, (N, K), jnp.float32)
    v = jax.random.normal(k_v, (F_, K), jnp.float32)
    b = jax.random.randint(k_b, (N,), 0, n_batches, jnp.int32)
    l = jax.random.uniform(k_l, (N,), jnp.float32, 1.0, 10.0)

    # Deterministic parameter init (shapes from __init__): (n_batches, n_features)
    scale_lin = _xavier_uniform(k_s, (n_batches, F_))
    bias = _xavier_uniform(k_bias, (n_batches, F_))

    # Small explicit tiles so the grid has multiple (and ragged) blocks.
    logits = ber_data_decoder(u, v, b, l, scale_lin, bias, tm=16, tn=128)
    jax.block_until_ready(logits)

    # Pure-JAX reference check of the Bernoulli logits.
    ref_logits = jax.nn.softplus(scale_lin[b]) * (u @ v.T) + bias[b]
    assert logits.shape == (N, F_)
    assert jnp.allclose(logits, ref_logits, atol=1e-4, rtol=1e-4)
    assert jnp.allclose(
        jax.nn.sigmoid(logits), jax.nn.sigmoid(ref_logits), atol=1e-5, rtol=1e-5
    )

    print("KERNEL_OK")
</pallas_src>

<mosaic_0001>
module attributes {stable_mosaic.version = 11 : i64} {
  func.func @_decoder_kernel(%arg0: i32, %arg1: i32, %arg2: memref<16x1xi32, #tpu.memory_space<vmem>>, %arg3: memref<16x32xf32, #tpu.memory_space<vmem>>, %arg4: memref<32x128xf32, #tpu.memory_space<vmem>>, %arg5: memref<8x128xf32, #tpu.memory_space<vmem>>, %arg6: memref<8x128xf32, #tpu.memory_space<vmem>>, %arg7: memref<16x128xf32, #tpu.memory_space<vmem>>) attributes {dimension_semantics = [#tpu.dimension_semantics<parallel>, #tpu.dimension_semantics<parallel>], iteration_bounds = array<i64: 3, 4>, scalar_prefetch = 0 : i64, scratch_operands = 0 : i64, tpu.core_type = #tpu.core_type<tc>, window_params = [{transform_indices = @transform_0, window_bounds = array<i64: 16, 1>}, {transform_indices = @transform_1, window_bounds = array<i64: 16, 32>}, {transform_indices = @transform_2, window_bounds = array<i64: 32, 128>}, {transform_indices = @transform_3, window_bounds = array<i64: 8, 128>}, {transform_indices = @transform_4, window_bounds = array<i64: 8, 128>}, {transform_indices = @transform_5, window_bounds = array<i64: 16, 128>}]} {
    %c0 = arith.constant 0 : index
    %c0_0 = arith.constant 0 : index
    %0 = vector.load %arg2[%c0, %c0_0] : memref<16x1xi32, #tpu.memory_space<vmem>>, vector<16x1xi32>
    %1 = tpu.iota {dimensions = array<i32: 1>} : vector<16x8xi32>
    %2 = vector.broadcast %0 : vector<16x1xi32> to vector<16x8xi32>
    %3 = arith.cmpi eq, %2, %1 : vector<16x8xi32>
    %4 = arith.extui %3 : vector<16x8xi1> to vector<16x8xi32>
    %5 = arith.sitofp %4 : vector<16x8xi32> to vector<16x8xf32>
    %c0_1 = arith.constant 0 : index
    %c0_2 = arith.constant 0 : index
    %6 = vector.load %arg5[%c0_1, %c0_2] : memref<8x128xf32, #tpu.memory_space<vmem>>, vector<8x128xf32>
    %cst = arith.constant dense<0.000000e+00> : vector<16x128xf32>
    %7 = tpu.matmul %5, %6, %cst {dimension_numbers = #tpu.dot_dimension_numbers<[1], [0], [0], [1], [0, 0, 1, 1], [], []>, precision = #tpu.contract_precision<fp32>} : vector<16x8xf32>, vector<8x128xf32>, vector<16x128xf32> -> vector<16x128xf32>
    %c0_3 = arith.constant 0 : index
    %c0_4 = arith.constant 0 : index
    %8 = vector.load %arg6[%c0_3, %c0_4] : memref<8x128xf32, #tpu.memory_space<vmem>>, vector<8x128xf32>
    %cst_5 = arith.constant dense<0.000000e+00> : vector<16x128xf32>
    %9 = tpu.matmul %5, %8, %cst_5 {dimension_numbers = #tpu.dot_dimension_numbers<[1], [0], [0], [1], [0, 0, 1, 1], [], []>, precision = #tpu.contract_precision<fp32>} : vector<16x8xf32>, vector<8x128xf32>, vector<16x128xf32> -> vector<16x128xf32>
    %c0_6 = arith.constant 0 : index
    %c0_7 = arith.constant 0 : index
    %10 = vector.load %arg3[%c0_6, %c0_7] : memref<16x32xf32, #tpu.memory_space<vmem>>, vector<16x32xf32>
    %c0_8 = arith.constant 0 : index
    %c0_9 = arith.constant 0 : index
    %11 = vector.load %arg4[%c0_8, %c0_9] : memref<32x128xf32, #tpu.memory_space<vmem>>, vector<32x128xf32>
    %cst_10 = arith.constant dense<0.000000e+00> : vector<16x128xf32>
    %12 = tpu.matmul %10, %11, %cst_10 {dimension_numbers = #tpu.dot_dimension_numbers<[1], [0], [0], [1], [0, 0, 1, 1], [], []>, precision = #tpu.contract_precision<fp32>} : vector<16x32xf32>, vector<32x128xf32>, vector<16x128xf32> -> vector<16x128xf32>
    %13 = arith.mulf %7, %12 : vector<16x128xf32>
    %14 = arith.addf %13, %9 : vector<16x128xf32>
    %c0_11 = arith.constant 0 : index
    %c0_12 = arith.constant 0 : index
    %15 = vector.load %arg7[%c0_11, %c0_12] : memref<16x128xf32, #tpu.memory_space<vmem>>, vector<16x128xf32>
    tpu.vector_store %arg7[%c0_11, %c0_12], %14 {strides = array<i32>} : memref<16x128xf32, #tpu.memory_space<vmem>>, vector<16x128xf32>,
    return
  }
  func.func @transform_0(%arg0: i32, %arg1: i32) -> (i32, i32) {
    %c0_i32 = arith.constant 0 : i32
    %c0_i32_0 = arith.constant 0 : i32
    return %arg1, %c0_i32 : i32, i32
  }
  func.func @transform_1(%arg0: i32, %arg1: i32) -> (i32, i32) {
    %c0_i32 = arith.constant 0 : i32
    %c0_i32_0 = arith.constant 0 : i32
    return %arg1, %c0_i32 : i32, i32
  }
  func.func @transform_2(%arg0: i32, %arg1: i32) -> (i32, i32) {
    %c0_i32 = arith.constant 0 : i32
    %c0_i32_0 = arith.constant 0 : i32
    return %c0_i32, %arg0 : i32, i32
  }
  func.func @transform_3(%arg0: i32, %arg1: i32) -> (i32, i32) {
    %c0_i32 = arith.constant 0 : i32
    %c0_i32_0 = arith.constant 0 : i32
    return %c0_i32, %arg0 : i32, i32
  }
  func.func @transform_4(%arg0: i32, %arg1: i32) -> (i32, i32) {
    %c0_i32 = arith.constant 0 : i32
    %c0_i32_0 = arith.constant 0 : i32
    return %c0_i32, %arg0 : i32, i32
  }
  func.func @transform_5(%arg0: i32, %arg1: i32) -> (i32, i32) {
    %c0_i32 = arith.constant 0 : i32
    return %arg1, %arg0 : i32, i32
  }
}

</mosaic_0001>

<bundles_post_ra>
// kernel: ber_data_decoder.1
= control target key start
LH: loop header
LB: loop body
LE: loop exit
PB: predicated region body
PF: predicated region fallthrough
CT: control target
= control target key end

     0   :  { %s2953_s0 = inlined_call_operand.vmem [shape: s32[50,1], index: 0, kind: input, shape index: {}]   ;;  %s2954_s1 = inlined_call_operand.vmem [shape: f32[50,32], index: 1, kind: input, shape index: {}]   ;;  %s2955_s2 = inlined_call_operand.vmem [shape: f32[32,300], index: 2, kind: input, shape index: {}]   ;;  %s2956_s3 = inlined_call_operand.vmem [shape: f32[8,300], index: 3, kind: input, shape index: {}]   ;;  %s2957_s4 = inlined_call_operand.vmem [shape: f32[8,300], index: 4, kind: input, shape index: {}]   ;;  %s2958_s5 = inlined_call_operand.hbm [shape: f32[50,300], index: 5, kind: output, shape index: {}]  }
   0x1   :  { %2963 = sst [smem:[#allocation10_spill]] %s2955_s2 }
   0x2   :  { %10 = vsyncpa [#allocation4], 0 }
   0x3   :  { %12 = vsyncpa [#allocation4 + $0x1], 0  ;;  %s2663_s18 = smov 0   ;;  %s2665_s19 = smov 0  }
   0x4   :  { %s2667_s20 = smov 0   ;;  %s2669_s21 = smov 0  }
   0x5   :  { %s2671_s22 = smov 0   ;;  %s2673_s23 = smov 0  }
   0x6   :  { %s2675_s24 = smov 0   ;;  %s2677_s25 = smov 0  }
   0x7   :  { %s2679_s26 = smov 0   ;;  %s2681_s27 = smov 0  }
   0x8 LB: > { %2964 = sst [smem:[#allocation6_spill]] %s2617_s25  ;;  %s2107_s28 = sadd.s32 4294967295, %s2625_s27   ;;  %s2625_s27 = sphi %s2681_s27, %s18_s27   ;;  %s2621_s26 = sphi %s2679_s26, %s2975_s26   ;;  %s2617_s25 = sphi %s2677_s25, %s2974_s25   ;;  %s2613_s24 = sphi %s2675_s24, %s2973_s24   ;;  %s2609_s23 = sphi %s2673_s23, %s2972_s23   ;;  %s2605_s22 = sphi %s2671_s22, %s2980_s22   ;;  %s2601_s21 = sphi %s2669_s21, %s2979_s21   ;;  %s2597_s20 = sphi %s2667_s20, %s2978_s20   ;;  %s2593_s19 = sphi %s2665_s19, %s2977_s19   ;;  %s2589_s18 = sphi %s2663_s18, %s2976_s18  }
   0x9   : > { %2965 = sst [smem:[#allocation7_spill]] %s2621_s26  ;;  %s2108_s29 = sadd.s32 4294967294, %s2625_s27  }
   0xa   : > { %s27_s30 = sadd.s32 1, %s2617_s25  ;;  %s30_s6 = sadd.s32 1, %s2621_s26 }
   0xb   : > { %p28_p0 = scmp.ge.s32.totalorder %s27_s30, 4  ;;  %s89_s7 = sadd.s32 1, %s2605_s22 }
   0xc   : > { %p96_p1 = scmp.ne.s32.totalorder %s2605_s22, %s2601_s21  ;;  %p97_p2 = scmp.eq.s32.totalorder %s2625_s27, 0 }
   0xd   : > { %s2982_s30 = smov (%p28_p0, %s27_s30), 0  ;;  %s2984_s6 = smov (!%p28_p0, %s30_s6), %s2621_s26 }
   0xe   : > { %2966 = sst [smem:[#allocation8_spill]] %s2982_s30  ;;  %p2724_p3 = por %p97_p2, %p96_p1 }
   0xf   : > { %s164_s9 = ssub.s32 %s2617_s25, %s2982_s30  ;;  %p32_p4 = scmp.ge.s32.totalorder %s2984_s6, 3 }
  0x10   : > { %s169_s10 = sadd.s32 1, %s2597_s20  ;;  %p179_p5 = scmp.ne.s32.totalorder %s2597_s20, %s2593_s19 }
  0x11   : > { %p180_p6 = scmp.eq.s32.totalorder %s2107_s28, 11  ;;  %s2986_s6 = smov (%p32_p4, %s2984_s6), 0 }
  0x12   : > { %2968 = sst [smem:[#allocation9_spill]] %s2986_s6  ;;  %p185_p8 = scmp.ne.s32.totalorder %s2593_s19, %s2589_s18 }
  0x13   : > { %p2735_p7 = por %p180_p6, %p179_p5  ;;  %s86_s12 = ssub.s32 %s2621_s26, %s2986_s6 }
  0x14   : > { %p186_p9 = scmp.eq.s32.totalorder %s2108_s29, 11  ;;  %p87_p10 = scmp.eq.s32.totalorder %s86_s12, 0 }
  0x15   : > { %s166_s13 = sor.u32 %s164_s9, %s86_s12  ;;  %p2110_p13 = scmp.ge.s32.totalorder %s2625_s27, 12 }
  0x16   : > { %p167_p11 = scmp.eq.s32.totalorder %s166_s13, 0  ;;  %p2743_p12 = por %p186_p9, %p185_p8 }
  0x17   : > { %s2748_s15 = scalar_select %p87_p10, %s2605_s22, %s89_s7  }
  0x18   : > { %s2751_s16 = scalar_select %p167_p11, %s2597_s20, %s169_s10  }
  0x19   : > { %202 = sbr.rel (%p2110_p13) target bundleno = 44 (0x2c), region = 16 }
  0x20   : > { %239 = sbr.rel (!%p2724_p3) target bundleno = 44 (0x2c), region = 28  ;;  %s241_s17 = sand.u32 (%p2724_p3), 1, %s2605_s22  }
  0x21   : > { %s2112_s28 = sshll.u32 (%p2724_p3), %s2621_s26, 3  ;;  %s2111_s29 = sshll.u32 (%p2724_p3), %s241_s17, 5 }
  0x22   : > { %s2971_s2 = sld [smem:[#allocation10_spill]] (%p2724_p3)  ;;  %s243_s7 = scalar_lea.vmem (%p2724_p3), [#allocation2], %s2111_s29 }
  0x28   : > { %s245_s13 = scalar_lea.vmem %s2971_s2, %s2112_s28 }
  0x29   : > { %v279_v0 = vld [vmem:[%s245_s13] sm:$0xff]  ;;  %v281_v1 = vld [vmem:[%s245_s13 + $0x18] sm:$0xff]  ;;  %v283_v2 = vld [vmem:[%s245_s13 + $0x30] sm:$0xff] }
  0x2a   : > { %280 = vst [vmem:[%s243_s7] sm:$0xff] %v279_v0  ;;  %282 = vst [vmem:[%s243_s7 + $0x8] sm:$0xff] %v281_v1  ;;  %v285_v3 = vld [vmem:[%s245_s13 + $0x48] sm:$0xff] }
  0x2b   : > { %284 = vst [vmem:[%s243_s7 + $0x10] sm:$0xff] %v283_v2  ;;  %286 = vst [vmem:[%s243_s7 + $0x18] sm:$0xff] %v285_v3 }
  0x2c PF: > { %p2113_p0 = scmp.ge.s32.totalorder %s2625_s27, 1  ;;  %p305_p1 = scmp.lt.s32.totalorder %s2625_s27, 13 }
  0x2e   : > { %p306_p2 = pnand %p2113_p0, %p305_p1 }
  0x2f   : > { %s2764_s8 = sshll.u32 (!%p306_p2), %s2609_s23, 1  ;;  %v2627_v4 = vmov (!%p306_p2), 0   ;;  %p393_p4 = scmp.lt.s32.totalorder (!%p306_p2), %s2613_s24, 2  ;;  %v408_v19 = vlaneseq (!%p306_p2)  ;;  %vm423_vm0 = vcmask (!%p306_p2), 64512   ;;  %v2628_v22 = vmov (!%p306_p2), 0.0  }
  0x30   : > { %309 = sbr.rel (%p306_p2) target bundleno = 517 (0x205), region = 74  ;;  %2514 = vset.pattern.permute.xlu0 (!%p306_p2), %v2627_v4  ;;  %p370_p3 = scmp.lt.s32.totalorder (!%p306_p2), %s2764_s8, 6  ;;  %vm1415_vm3 = vcmask (!%p306_p2), 261120  }
  0x31   : > { %v409_v20 = vand.u32 (!%p306_p2), 127, %v408_v19  ;;  %s312_s2 = sand.u32 (!%p306_p2), 1, %s2601_s21  }
  0x37   : > { %s2768_s10 = scalar_select %p370_p3, %s2764_s8, 6 }
  0x38   : > { %s394_s12 = scalar_select %p393_p4, %s2613_s24, 2 }
  0x39   : > { %s2117_s17 = sshll.u32 %s2768_s10, 3  ;;  %s362_s10 = sand.u32 1, %s2593_s19  }
  0x3a   : > { %s373_s9 = scalar_lea.vmem %s2953_s0, %s2117_s17  ;;  %s2120_s13 = sshll.u32 %s394_s12, 3 }
  0x3b   : > { %v406_v5 = vld [vmem:[%s373_s9] sm:$0xff]  ;;  %v407_v6 = vld [vmem:[%s373_s9 + $0x8] sm:$0xff]  ;;  %s396_s6 = scalar_lea.vmem %s2956_s3, %s2120_s13  ;;  %s400_s25 = scalar_lea.vmem %s2957_s4, %s2120_s13 }
  0x3c   : > { %411 = vperm.xlu0 %2514, %v406_v5   ;;  %v422_v7 = vld [vmem:[%s396_s6] sm:$0xff]  ;;  %s387_s6 = scalar_lea.vmem %s2954_s1, %s2117_s17  ;;  %s2115_s17 = sshll.u32 %s362_s10, 4 }
  0x3d   : > { %v919_v8 = vld [vmem:[%s400_s25] sm:$0xff]  ;;  %v2784_v9 = vand.u32 4294901760, %v422_v7  ;;  %s2114_s25 = sshll.u32 %s312_s2, 5  ;;  %v1410_v40 = vld [vmem:[%s387_s6 + $0x8] sm:$0xff]  ;;  %s364_s28 = scalar_lea.vmem [#allocation3], %s2115_s17 }
  0x3e   : > { %v2786_v10 = vand.u32 4294901760, %v919_v8  ;;  %v1409_v36 = vld [vmem:[%s387_s6] sm:$0xff]  ;;  %s314_s21 = scalar_lea.vmem [#allocation2], %s2114_s25  ;;  %v1420_v46 = vsel %vm1415_vm3, %v1410_v40, 0  ;;  %s2875_s29 = scalar_lea.sflag [#allocation4], %s362_s10 }
  0x3f   : > { %2218 = vmatprep.subr.mxu0 %v2784_v9  ;;  %v518_v11 = vsub.f32 %v422_v7, %v2784_v9  ;;  %v1411_v37 = vld [vmem:[%s314_s21] sm:$0xff]  ;;  %v1412_v38 = vld [vmem:[%s314_s21 + $0x8] sm:$0xff]  ;;  %v1417_v39 = vsel %vm1415_vm3, %v1409_v36, 0  ;;  %v1413_v44 = vld [vmem:[%s314_s21 + $0x10] sm:$0xff]  ;;  %v2843_v52 = vand.u32 4294901760, %v1420_v46  ;;  %s1965_s9 = ssub.s32 (%p2735_p7), 7, %s2764_s8 }
  0x40   : > { %414 = vperm.xlu0 %2514, %v407_v6   ;;  %2248 = vmatprep.subr.mxu1 %v2786_v10  ;;  %v1008_v12 = vsub.f32 %v919_v8, %v2786_v10  ;;  %v1423_v41 = vand.u32 4294901760, %v1411_v37  ;;  %v1426_v42 = vand.u32 4294901760, %v1412_v38  ;;  %v2829_v43 = vand.u32 4294901760, %v1417_v39  ;;  %v1414_v45 = vld [vmem:[%s314_s21 + $0x18] sm:$0xff]  ;;  %p1966_p5 = scmp.lt.s32.totalorder (%p2735_p7), %s1965_s9, 2 }
  0x41   : > { %2219 = vmatpush3.msra.mxu0 %v2784_v9  ;;  %2249 = vmatpush3.msra.mxu1 %v2786_v10  ;;  %v2794_v13 = vand.u32 4294901760, %v518_v11  ;;  %v1429_v47 = vand.u32 4294901760, %v1413_v44  ;;  %v1432_v48 = vand.u32 4294901760, %v1414_v45  ;;  %v2847_v59 = vsub.f32 %v1420_v46, %v2843_v52 }
  0x42   : > { %v2796_v14 = vand.u32 4294901760, %v1008_v12  ;;  %v1513_v49 = vsub.f32 %v1411_v37, %v1423_v41  ;;  %v1520_v50 = vsub.f32 %v1412_v38, %v1426_v42  ;;  %v2839_v51 = vsub.f32 %v1417_v39, %v2829_v43 }
  0x43   : > { %v520_v15 = vsub.f32 %v518_v11, %v2794_v13  ;;  %v1527_v55 = vsub.f32 %v1413_v44, %v1429_v47  ;;  %v1534_v56 = vsub.f32 %v1414_v45, %v1432_v48  ;;  %v2344_v57 = vpack.c.bf16 %v1426_v42, %v1423_v41 }
  0x44   : > { %v1010_v16 = vsub.f32 %v1008_v12, %v2796_v14  ;;  %v1514_v53 = vand.u32 4294901760, %v1513_v49  ;;  %v1521_v54 = vand.u32 4294901760, %v1520_v50  ;;  %v1493_v58 = vand.u32 4294901760, %v2839_v51 }
  0x45   : > { %v521_v17 = vand.u32 4294901760, %v520_v15  ;;  %v1528_v62 = vand.u32 4294901760, %v1527_v55  ;;  %v1535_v63 = vand.u32 4294901760, %v1534_v56  ;;  %v1503_v1 = vand.u32 4294901760, %v2847_v59 }
  0x46   : > { %v1011_v18 = vand.u32 4294901760, %v1010_v16  ;;  %v1515_v60 = vsub.f32 %v1513_v49, %v1514_v53  ;;  %v1522_v61 = vsub.f32 %v1520_v50, %v1521_v54  ;;  %v1494_v0 = vsub.f32 %v2839_v51, %v1493_v58 }
  0x47   : > { %2223 = vmatprep.subr.mxu0 %v521_v17  ;;  %v2348_v2 = vpack.c.bf16 %v1432_v48, %v1429_v47  ;;  %v1529_v5 = vsub.f32 %v1527_v55, %v1528_v62  ;;  %v1536_v6 = vsub.f32 %v1534_v56, %v1535_v63  ;;  %v1504_v8 = vsub.f32 %v2847_v59, %v1503_v1 }
  0x48   : > { %2253 = vmatprep.subr.mxu1 %v1011_v18  ;;  %v1516_v3 = vand.u32 4294901760, %v1515_v60  ;;  %v1523_v4 = vand.u32 4294901760, %v1522_v61  ;;  %v1495_v7 = vand.u32 4294901760, %v1494_v0  ;;  %v2380_v15 = vpack.c.bf16 %v1535_v63, %v1528_v62 }
  0x49   : > { %v2360_v16 = vpack.c.bf16 %v1520_v50, %v1513_v49 }
  0xbb   : > { %v412_v21 = vpop.permute.xlu0 %411 }
  0xbc   : > { %vm416_vm1 = vcmp.eq.s32.totalorder %v412_v21, %v409_v20 }
  0xbd   : > { %v2800_v23 = vsel %vm416_vm1, 1.0, %v2628_v22 }
  0xbe   : > { %v425_v24 = vsel %vm423_vm0, %v2800_v23, 0 }
  0xbf   : > { %v415_v25 = vpop.permute.xlu0 %414  ;;  %v497_v26 = vsub.f32 %v425_v24, %v425_v24 }
  0xc0   : > { %vm417_vm2 = vcmp.eq.s32.totalorder %v415_v25, %v409_v20 }
  0xc1   : > { %v2804_v27 = vsel %vm417_vm2, 1.0, %v2628_v22  ;;  %v498_v28 = vand.u32 4294901760, %v497_v26 }
  0xc2   : > { %v428_v29 = vsel %vm423_vm0, %v2804_v27, 0 }
  0xc3   : > { %v499_v30 = vsub.f32 %v497_v26, %v498_v28  ;;  %v507_v31 = vsub.f32 %v428_v29, %v428_v29 }
  0xc5   : > { %v500_v32 = vand.u32 4294901760, %v499_v30  ;;  %v508_v33 = vand.u32 4294901760, %v507_v31 }
  0xc7   : > { %2220 = vmatprep.mubr.f32.mxu0 %v500_v32  ;;  %2250 = vmatprep.mubr.f32.mxu1 %v500_v32  ;;  %v509_v34 = vsub.f32 %v507_v31, %v508_v33 }
  0xc9   : > { %v510_v35 = vand.u32 4294901760, %v509_v34 }
  0xcb   : > { %2221 = vmatmul.mubr.f32.vlgmr.msra.gmra.mrb[0].mxu0 %v510_v35  ;;  %2251 = vmatmul.mubr.f32.vlgmr.msra.gmra.mrb[0].mxu1 %v510_v35 }
  0xcc   : > { %2224 = vmatpush3.msra.mxu0 %v521_v17  ;;  %2225 = vmatprep.mubr.msk.f32.mxu0 %vm423_vm0, %v2800_v23  ;;  %v2364_v17 = vpack.c.bf16 %v1534_v56, %v1527_v55 }
  0xcd   : > { %2254 = vmatpush3.msra.mxu1 %v1011_v18  ;;  %2255 = vmatprep.mubr.msk.f32.mxu1 %vm423_vm0, %v2800_v23 }
  0xce   : > { %2228 = vmatprep.subr.mxu0 %v518_v11  ;;  %2258 = vmatprep.subr.mxu1 %v1008_v12 }
  0xd3   : > { %2226 = vmatmul.mubr.msk.f32.vlgmr.msra.gmra.mrb[0].mxu0 %vm423_vm0, %v2804_v27  ;;  %2256 = vmatmul.mubr.msk.f32.vlgmr.msra.gmra.mrb[0].mxu1 %vm423_vm0, %v2804_v27 }
  0xd4   : > { %2229 = vmatpush3.msra.mxu0 %v518_v11  ;;  %2230 = vmatprep.mubr.f32.mxu0 %v497_v26  ;;  %v1530_v11 = vand.u32 4294901760, %v1529_v5 }
  0xd5   : > { %2259 = vmatpush3.msra.mxu1 %v1008_v12  ;;  %2260 = vmatprep.mubr.f32.mxu1 %v497_v26  ;;  %v1537_v12 = vand.u32 4294901760, %v1536_v6 }
  0xd6   : > { %2233 = vmatprep.subr.mxu0 %v2784_v9  ;;  %2263 = vmatprep.subr.mxu1 %v2786_v10 }
  0xdb   : > { %2231 = vmatmul.mubr.f32.vlgmr.msra.gmra.mrb[0].mxu0 %v507_v31  ;;  %2261 = vmatmul.mubr.f32.vlgmr.msra.gmra.mrb[0].mxu1 %v507_v31 }
  0xdc   : > { %2234 = vmatpush3.msra.mxu0 %v2784_v9  ;;  %2235 = vmatprep.mubr.f32.mxu0 %v498_v28 }
  0xdd   : > { %2264 = vmatpush3.msra.mxu1 %v2786_v10  ;;  %2265 = vmatprep.mubr.f32.mxu1 %v498_v28 }
  0xde   : > { %2238 = vmatprep.subr.mxu0 %v2794_v13  ;;  %2268 = vmatprep.subr.mxu1 %v2796_v14 }
  0xe3   : > { %2236 = vmatmul.mubr.f32.vlgmr.msra.gmra.mrb[0].mxu0 %v508_v33  ;;  %2266 = vmatmul.mubr.f32.vlgmr.msra.gmra.mrb[0].mxu1 %v508_v33 }
  0xe4   : > { %2239 = vmatpush3.msra.mxu0 %v2794_v13  ;;  %2240 = vmatprep.mubr.msk.f32.mxu0 %vm423_vm0, %v2800_v23  ;;  %v1505_v13 = vand.u32 4294901760, %v1504_v8 }
  0xe5   : > { %2269 = vmatpush3.msra.mxu1 %v2796_v14  ;;  %2270 = vmatprep.mubr.msk.f32.mxu1 %vm423_vm0, %v2800_v23  ;;  %v2356_v14 = vpack.c.bf16 %v1537_v12, %v1530_v11 }
  0xe6   : > { %2243 = vmatprep.subr.mxu0 %v2784_v9  ;;  %2273 = vmatprep.subr.mxu1 %v2786_v10 }
  0xeb   : > { %2241 = vmatmul.mubr.msk.f32.vlgmr.msra.gmra.mrb[0].mxu0 %vm423_vm0, %v2804_v27  ;;  %2271 = vmatmul.mubr.msk.f32.vlgmr.msra.gmra.mrb[0].mxu1 %vm423_vm0, %v2804_v27 }
  0xec   : > { %2244 = vmatpush3.msra.mxu0 %v2784_v9  ;;  %2245 = vmatprep.mubr.msk.f32.mxu0 %vm423_vm0, %v2800_v23  ;;  %v2352_v9 = vpack.c.bf16 %v1523_v4, %v1516_v3 }
  0xed   : > { %2274 = vmatpush3.msra.mxu1 %v2786_v10  ;;  %2275 = vmatprep.mubr.msk.f32.mxu1 %vm423_vm0, %v2800_v23  ;;  %v2376_v10 = vpack.c.bf16 %v1521_v54, %v1514_v53 }
  0xee   : > { %2345 = vmatprep.subr.bf16.mxu1 %v2344_v57  ;;  %2369 = vmatprep.subr.bf16.mxu0 %v2344_v57 }
  0xf3   : > { %2246 = vmatmul.mubr.msk.f32.vlgmr.msra.gmra.mrb[0].mxu0 %vm423_vm0, %v2804_v27  ;;  %2276 = vmatmul.mubr.msk.f32.vlgmr.msra.gmra.mrb[0].mxu1 %vm423_vm0, %v2804_v27 }
  0xf4   : > { %2347 = vmatpush3.bf16.msra.mxu1 %v2344_v57  ;;  %2371 = vmatpush3.bf16.msra.mxu0 %v2344_v57 }
  0xf5   : > { %2349 = vmatprep.subr.bf16.mxu1 %v2348_v2  ;;  %2373 = vmatprep.subr.bf16.mxu0 %v2348_v2 }
  0xf6   : > { %2286 = vmatprep.mubr.f32.mxu1 %v1495_v7  ;;  %2319 = vmatprep.mubr.f32.mxu0 %v1493_v58 }
  0xf8   : > { %2351 = vmatpush3.bf16.msra.mxu1 %v2348_v2  ;;  %2375 = vmatpush3.bf16.msra.mxu0 %v2348_v2 }
  0xf9   : > { %2353 = vmatprep.subr.bf16.mxu1 %v2352_v9  ;;  %2377 = vmatprep.subr.bf16.mxu0 %v2376_v10 }
  0xfb   : > { %2287 = vmatmul.mubr.f32.vlgmr.msra.gmra.mrb[2].mxu1 %v1505_v13  ;;  %2320 = vmatmul.mubr.f32.vlgmr.msra.gmra.mrb[2].mxu0 %v1503_v1 }
  0xfc   : > { %2355 = vmatpush3.bf16.msra.mxu1 %v2352_v9  ;;  %2379 = vmatpush3.bf16.msra.mxu0 %v2376_v10 }
  0xfd   : > { %2357 = vmatprep.subr.bf16.mxu1 %v2356_v14  ;;  %2381 = vmatprep.subr.bf16.mxu0 %v2380_v15 }
  0xfe   : > { %2297 = vmatprep.mubr.f32.mxu1 %v2829_v43  ;;  %2330 = vmatprep.mubr.f32.mxu0 %v2829_v43 }
 0x100   : > { %2359 = vmatpush3.bf16.msra.mxu1 %v2356_v14  ;;  %2383 = vmatpush3.bf16.msra.mxu0 %v2380_v15 }
 0x101   : > { %2361 = vmatprep.subr.bf16.mxu1 %v2360_v16  ;;  %2385 = vmatprep.subr.bf16.mxu0 %v2344_v57 }
 0x103   : > { %2298 = vmatmul.mubr.f32.vlgmr.msra.gmra.mrb[2].mxu1 %v2843_v52  ;;  %2331 = vmatmul.mubr.f32.vlgmr.msra.gmra.mrb[2].mxu0 %v2843_v52 }
 0x104   : > { %2363 = vmatpush3.bf16.msra.mxu1 %v2360_v16  ;;  %2387 = vmatpush3.bf16.msra.mxu0 %v2344_v57 }
 0x105   : > { %2365 = vmatprep.subr.bf16.mxu1 %v2364_v17  ;;  %2389 = vmatprep.subr.bf16.mxu0 %v2348_v2 }
 0x106   : > { %2308 = vmatprep.mubr.f32.mxu1 %v2839_v51  ;;  %2341 = vmatprep.mubr.f32.mxu0 %v2829_v43 }
 0x108   : > { %2367 = vmatpush3.bf16.msra.mxu1 %v2364_v17  ;;  %2391 = vmatpush3.bf16.msra.mxu0 %v2348_v2 }
 0x10b   : > { %2309 = vmatmul.mubr.f32.vlgmr.msra.gmra.mrb[2].mxu1 %v2847_v59  ;;  %2342 = vmatmul.mubr.f32.vlgmr.msra.gmra.mrb[2].mxu0 %v2843_v52 }
 0x1c6   : > { %v2247_v18 = vpop.f32.mrb[0].mxu0  ;;  %v2277_v19 = vpop.f32.mrb[0].mxu1 }
 0x1c7   : > { %v909_v20 = vpop.f32.mrb[1].mxu0  ;;  %v1399_v21 = vpop.f32.mrb[1].mxu1 }
 0x1de   : > { %v2310_v22 = vpop.f32.mrb[2].mxu1  ;;  %v2343_v23 = vpop.f32.mrb[2].mxu0 }
 0x1df   : > { %v2392_v24 = vadd.f32 %v2343_v23, %v2310_v22  ;;  %v1684_v25 = vpop.f32.mrb[3].mxu1  ;;  %v1940_v26 = vpop.f32.mrb[3].mxu0 }
 0x1e0   : > { %v2393_v27 = vadd.f32 %v1940_v26, %v1684_v25  ;;  %1963 = sbr.rel (!%p2735_p7) target bundleno = 517 (0x205), region = 82 }
 0x1e1   : > { %v1951_v28 = vmul.f32 %v2392_v24, %v2247_v18 }
 0x1e2   : > { %v1950_v29 = vmul.f32 %v2393_v27, %v909_v20 }
 0x1e3   : > { %v1953_v30 = vadd.f32 %v2277_v19, %v1951_v28 }
 0x1e4   : > { %v1952_v31 = vadd.f32 %v1950_v29, %v1399_v21 }
 0x1e5   : > { %1955 = vst [vmem:[%s364_s28 + $0x8] sm:$0xff] %v1953_v30 }
 0x1e6   : > { %1954 = vst [vmem:[%s364_s28] sm:$0xff] %v1952_v31 }
 0x1e7   : > { %s2988_s9 = smov (!%p1966_p5, %s1965_s9), 2 }
 0x1e8   : > { %s2880_s12 = sshll.u32 %s2988_s9, 7 }
 0x1e9   : > { %s1970_s13 = ssub.s32 256, %s2880_s12 }
 0x1ea   : > { %1971 = vsyncadd %s2875_s29, %s1970_s13  ;;  %p2139_p6 = scmp.ne.s32.totalorder %s2880_s12, 0  ;;  %s2422_s7 = smul.u32 6, %s2609_s23 }
 0x1eb   : > { %s1978_s2 = sshll.u32 %s364_s28, 4  ;;  %s2629_s21 = smov [#allocation3]   ;;  %s2887_s2 = int_to_ptr.vmem [resolvable:$true] %s1978_s2 }
 0x1ec   : > { %s1974_s11 = sadd.s32 %s2613_s24, %s2422_s7  ;;  %s2515_s6 = scalar_lea.vmem %s2887_s2, %s2880_s12 }
 0x1ed   : > { %s2141_s8 = sshll.u32 %s1974_s11, 7  ;;  %p2516_p7 = scmp.ne.s32.totalorder %s2887_s2, %s2515_s6 }
 0x1ee   : > { %s2892_s30 = scalar_lea.hbm %s2958_s5, %s2141_s8  ;;  %s2519_s23 = sshll.u32 %s2629_s21, 4  ;;  %s2520_s23 = int_to_ptr.vmem [resolvable:$false] %s2519_s23 }
 0x1ef   : > { %p2517_p8 = pnand %p2516_p7, %p2139_p6  ;;  %s2521_s24 = scalar_lea.vmem %s2520_s23, 512 }
 0x1f0   : > { %p2522_p10 = scmp.lt.s32.totalorder %s2887_s2, %s2520_s23  ;;  %p2523_p11 = scmp.lt.s32.totalorder %s2521_s24, %s2515_s6 }
 0x1f1   : > { %p2518_p9 = pneg %p2517_p8 }
 0x1f2   : > { %p2524_p13 = por %p2523_p11, %p2522_p10 }
 0x1f4   : > { %p2525_p0 = pnand %p2524_p13, %p2518_p9 }
 0x1f6   : > { %2528 = shalt.err (!%p2525_p0)
}
 0x1f7   : > { %s2529_s10 = scalar_lea.hbm %s2892_s30, %s2880_s12  ;;  %s2533_s9 = scalar_lea.hbm %s2958_s5, 2688 }
 0x1f8   : > { %p2530_p1 = scmp.ne.s32.totalorder %s2892_s30, %s2529_s10  ;;  %p2534_p4 = scmp.lt.u32.totalorder %s2892_s30, %s2958_s5 }
 0x1f9   : > { %p2535_p5 = scmp.lt.u32.totalorder %s2533_s9, %s2529_s10  ;;  %p2537_p8 = scmp.lt.u32.totalorder %s2529_s10, %s2892_s30 }
 0x1fa   : > { %p2531_p2 = pnand %p2530_p1, %p2139_p6 }
 0x1fb   : > { %p2536_p7 = por %p2535_p5, %p2534_p4 }
 0x1fc   : > { %p2532_p3 = pneg %p2531_p2 }
 0x1fd   : > { %p2538_p9 = por %p2537_p8, %p2536_p7 }
 0x1ff   : > { %p2539_p10 = pnand %p2538_p9, %p2532_p3 }
 0x201   : > { %2542 = shalt.err (!%p2539_p10)
}
 0x202   : > { %s2630_s11 = smov 128   ;;  %s2631_s8 = smov 384  }
 0x203   : > { %s2632_s25 = smov 8  }
 0x204   : > { %1984 = dma.vmem_to_hbm [thread:$0]  (%p2139_p6), %s2887_s2, %s2880_s12, %s2892_s30, %s2875_s29, %s2630_s11, %s2631_s8, %s2632_s25  }
 0x205 PF: > { %p2428_p11 = scmp.ge.s32.totalorder %s2625_s27, 2  ;;  %s1993_s26 = sand.u32 1, %s2589_s18  }
 0x206   : > { %s1994_s6 = scalar_lea.sflag [#allocation4], %s1993_s26 }
 0x207   : > { %p2425_p13 = pnand %p2428_p11, %p2743_p12 }
 0x209   : > { %2584 = dma.done.wait (!%p2425_p13), %s1994_s6, 256  }
 0x20a   : > { %2586 = vsyncadd (!%p2425_p13), %s1994_s6, 4294967040  ;;  %s18_s27 = sadd.s32 1, %s2625_s27   ;;  %s2972_s23 = sld [smem:[#allocation6_spill]] }
 0x20b   : > { %p15_p0 = scmp.ge.s32.totalorder %s18_s27, 14   ;;  %s2973_s24 = sld [smem:[#allocation7_spill]] }
 0x20c   : > { %s2974_s25 = sld [smem:[#allocation8_spill]]  ;;  %s2975_s26 = sld [smem:[#allocation9_spill]] }
 0x20d   : > { %s2976_s18 = smov %s2593_s19  ;;  %s2977_s19 = smov %s2597_s20 }
 0x20e   : > { %s2978_s20 = smov %s2751_s16  ;;  %s2979_s21 = smov %s2605_s22 }
 0x20f   : > { %s2980_s22 = smov %s2748_s15  ;;  %17 = sbr.rel (!%p15_p0) target bundleno = 8 (0x8), region = 130 }
 0x216   :  { %1999 = vsyncpa [#allocation4], 1 }
 0x217   :  { %2001 = vsyncpa [#allocation4 + $0x1], 1 }

</bundles_post_ra>
